<compile_context>
chip_gen: v5e
topology: v5e:2x2
jax: 0.10.0
libtpu: 0.0.40
codegen_flags: <defaults>
</compile_context>

<pallas_src>
import functools

import jax
import jax.numpy as jnp
from jax import lax
from jax.experimental import pallas as pl
from jax.experimental.pallas import tpu as pltpu


LEAKY_SLOPE = 0.01   # torch.nn.LeakyReLU default negative_slope
_LANE = 128          # TPU lane width  (last dim)
_SUBLANE = 8         # TPU sublane width (second-last dim)


def _pad_axis(a, axis, multiple):
    """Zero-pad `a` along `axis` up to the next multiple of `multiple`."""
    pad = (-a.shape[axis]) % multiple
    if pad == 0:
        return a
    widths = [(0, 0)] * a.ndim
    widths[axis] = (0, pad)
    return jnp.pad(a, widths)


def _mlp_softmax_kernel(x_ref, w1_ref, b1_ref, w2_ref, b2_ref, o_ref, *,
                        batch, b_pad):
    # One grid step handles one independent problem instance. All tiles are
    # lane-dense (padded to 128) so both matmuls hit native MXU tiles and the
    # output store is an unmasked full-lane vst.
    x = x_ref[0]                                                     # (B_pad, IN_pad) f32

    # Layer 1: Linear(in_dim -> hidden) + LeakyReLU
    h = jnp.dot(x, w1_ref[...], preferred_element_type=jnp.float32) + b1_ref[...]
    h = jnp.where(h > 0, h, LEAKY_SLOPE * h)

    # Layer 2: Linear(hidden -> out_dim)
    logits = jnp.dot(h, w2_ref[...], preferred_element_type=jnp.float32) + b2_ref[...]

    # If the batch axis was padded, mask the padding rows to -inf so the
    # dim-0 softmax only sees the real rows (static check; no-op when aligned).
    if batch < b_pad:
        row = lax.broadcasted_iota(jnp.int32, logits.shape, 0)
        logits = jnp.where(row < batch, logits, -jnp.inf)

    # Softmax over dim=0 (the batch axis), numerically stabilized.
    m = jnp.max(logits, axis=0, keepdims=True)
    e = jnp.exp(logits - m)
    denom = jnp.sum(e, axis=0, keepdims=True)
    o_ref[0] = e * pl.reciprocal(denom, approx=False)


def neural_network_forward_batched(x, w1, b1, w2, b2):
    """Batched forward.

    x : (N, B, in_dim)  -- N independent problem instances
    w1: (in_dim, H)     b1: (H,) or (1, H)
    w2: (H, out_dim)    b2: (out_dim,) or (1, out_dim)
    returns (N, B, out_dim) with softmax taken over the B axis of each instance.
    """
    x = x.astype(jnp.float32)                      # matches x.float() in PyTorch
    w1 = w1.astype(jnp.float32)
    w2 = w2.astype(jnp.float32)
    b1 = jnp.reshape(b1, (1, -1)).astype(jnp.float32)
    b2 = jnp.reshape(b2, (1, -1)).astype(jnp.float32)

    n, batch, in_dim = x.shape
    hidden = w1.shape[1]
    out_dim = w2.shape[1]

    # Lane-dense padding: lanes (last dim) to 128, sublanes (batch) to 8.
    x_p = _pad_axis(_pad_axis(x, 2, _LANE), 1, _SUBLANE)
    w1_p = _pad_axis(_pad_axis(w1, 0, _LANE), 1, _LANE)
    b1_p = _pad_axis(b1, 1, _LANE)
    w2_p = _pad_axis(_pad_axis(w2, 0, _LANE), 1, _LANE)
    b2_p = _pad_axis(b2, 1, _LANE)

    _, b_pad, in_pad = x_p.shape
    h_pad = w1_p.shape[1]
    out_pad = w2_p.shape[1]

    # NOTE: the whole (padded) batch fits one block here.
    # TODO(synk): for very large B, tile B with an online dim-0 softmax
    # (running max/sum in VMEM scratch, pl.when init/finalize).

    kernel = functools.partial(_mlp_softmax_kernel, batch=batch, b_pad=b_pad)

    out = pl.pallas_call(
        kernel,
        out_shape=jax.ShapeDtypeStruct((n, b_pad, out_pad), jnp.float32),
        grid=(n,),
        in_specs=[
            pl.BlockSpec((1, b_pad, in_pad), lambda i: (i, 0, 0)),
            # Constant index_maps -> weights/biases stay VMEM-resident across
            # the whole grid (DMA'd once).
            pl.BlockSpec((in_pad, h_pad), lambda i: (0, 0)),
            pl.BlockSpec((1, h_pad), lambda i: (0, 0)),
            pl.BlockSpec((h_pad, out_pad), lambda i: (0, 0)),
            pl.BlockSpec((1, out_pad), lambda i: (0, 0)),
        ],
        out_specs=pl.BlockSpec((1, b_pad, out_pad), lambda i: (i, 0, 0)),
        compiler_params=pltpu.CompilerParams(
            dimension_semantics=("parallel",),   # shard instances across TCs (v7x)
            vmem_limit_bytes=32 * 1024 * 1024,   # safe on v7x's 64 MiB VMEM
        ),
    )(x_p, w1_p, b1_p, w2_p, b2_p)

    return out[:, :batch, :out_dim]


def neural_network_forward(x, w1, b1, w2, b2):
    """Single-instance forward: x is (B, in_dim); returns (B, out_dim)."""
    return neural_network_forward_batched(x[None], w1, b1, w2, b2)[0]


def _reference(x, w1, b1, w2, b2):
    x = x.astype(jnp.float32)
    h = x @ w1 + jnp.reshape(b1, (1, -1))
    h = jnp.where(h > 0, h, LEAKY_SLOPE * h)
    logits = h @ w2 + jnp.reshape(b2, (1, -1))
    return jax.nn.softmax(logits, axis=0)


if __name__ == "__main__":
    # Small shapes consistent with the module: in_dim=16 -> hidden=32
    # (2*in_dim default), out_dim=8, batch=8, and N=4 independent instances
    # batched behind one pallas_call grid.
    n_inst, batch, in_dim, out_dim = 4, 8, 16, 8
    hidden_dim = in_dim * 2

    key = jax.random.PRNGKey(0)
    kx, kw1, kb1, kw2, kb2 = jax.random.split(key, 5)

    # Deterministic synthetic parameters (PyTorch-like uniform fan-in scaling).
    bound1 = 1.0 / jnp.sqrt(in_dim)
    bound2 = 1.0 / jnp.sqrt(hidden_dim)
    w1 = jax.random.uniform(kw1, (in_dim, hidden_dim), jnp.float32, -bound1, bound1)
    b1 = jax.random.uniform(kb1, (1, hidden_dim), jnp.float32, -bound1, bound1)
    w2 = jax.random.uniform(kw2, (hidden_dim, out_dim), jnp.float32, -bound2, bound2)
    b2 = jax.random.uniform(kb2, (1, out_dim), jnp.float32, -bound2, bound2)

    x = jax.random.normal(kx, (n_inst, batch, in_dim), jnp.float32)

    # Batched (grid) path.
    out = neural_network_forward_batched(x, w1, b1, w2, b2)
    out = jax.block_until_ready(out)
    assert out.shape == (n_inst, batch, out_dim)

    ref = jax.vmap(_reference, in_axes=(0, None, None, None, None))(x, w1, b1, w2, b2)
    assert jnp.allclose(out, ref, atol=1e-5, rtol=1e-5), "batched mismatch vs JAX reference"
    # softmax over dim=0 -> each column of each instance sums to 1
    assert jnp.allclose(jnp.sum(out, axis=1), jnp.ones((n_inst, out_dim)), atol=1e-5)

    # Single-instance path (matches the PyTorch module's forward signature).
    out1 = jax.block_until_ready(neural_network_forward(x[0], w1, b1, w2, b2))
    assert out1.shape == (batch, out_dim)
    assert jnp.allclose(out1, _reference(x[0], w1, b1, w2, b2), atol=1e-5, rtol=1e-5)

    print("KERNEL_OK")
</pallas_src>

<mosaic_0001>
module attributes {stable_mosaic.version = 11 : i64} {
  func.func @_mlp_softmax_kernel(%arg0: i32, %arg1: memref<1x8x128xf32, #tpu.memory_space<vmem>>, %arg2: memref<128x128xf32, #tpu.memory_space<vmem>>, %arg3: memref<1x128xf32, #tpu.memory_space<vmem>>, %arg4: memref<128x128xf32, #tpu.memory_space<vmem>>, %arg5: memref<1x128xf32, #tpu.memory_space<vmem>>, %arg6: memref<1x8x128xf32, #tpu.memory_space<vmem>>) attributes {dimension_semantics = [#tpu.dimension_semantics<parallel>], iteration_bounds = array<i64: 4>, scalar_prefetch = 0 : i64, scratch_operands = 0 : i64, tpu.core_type = #tpu.core_type<tc>, window_params = [{transform_indices = @transform_0, window_bounds = array<i64: 1, 8, 128>}, {pipeline_mode = #tpu.pipeline_mode<synchronous>, transform_indices = @transform_1, window_bounds = array<i64: 128, 128>}, {pipeline_mode = #tpu.pipeline_mode<synchronous>, transform_indices = @transform_2, window_bounds = array<i64: 1, 128>}, {pipeline_mode = #tpu.pipeline_mode<synchronous>, transform_indices = @transform_3, window_bounds = array<i64: 128, 128>}, {pipeline_mode = #tpu.pipeline_mode<synchronous>, transform_indices = @transform_4, window_bounds = array<i64: 1, 128>}, {transform_indices = @transform_5, window_bounds = array<i64: 1, 8, 128>}]} {
    %c0 = arith.constant 0 : index
    %c0_0 = arith.constant 0 : index
    %c0_1 = arith.constant 0 : index
    %0 = vector.load %arg1[%c0, %c0_0, %c0_1] : memref<1x8x128xf32, #tpu.memory_space<vmem>>, vector<1x8x128xf32>
    %1 = vector.shape_cast %0 : vector<1x8x128xf32> to vector<8x128xf32>
    %c0_2 = arith.constant 0 : index
    %c0_3 = arith.constant 0 : index
    %2 = vector.load %arg2[%c0_2, %c0_3] : memref<128x128xf32, #tpu.memory_space<vmem>>, vector<128x128xf32>
    %cst = arith.constant dense<0.000000e+00> : vector<8x128xf32>
    %3 = tpu.matmul %1, %2, %cst {dimension_numbers = #tpu.dot_dimension_numbers<[1], [0], [0], [1], [0, 0, 1, 1], [], []>} : vector<8x128xf32>, vector<128x128xf32>, vector<8x128xf32> -> vector<8x128xf32>
    %c0_4 = arith.constant 0 : index
    %c0_5 = arith.constant 0 : index
    %4 = vector.load %arg3[%c0_4, %c0_5] : memref<1x128xf32, #tpu.memory_space<vmem>>, vector<1x128xf32>
    %5 = vector.broadcast %4 : vector<1x128xf32> to vector<8x128xf32>
    %6 = arith.addf %3, %5 : vector<8x128xf32>
    %cst_6 = arith.constant 0.000000e+00 : f32
    %7 = vector.broadcast %cst_6 : f32 to vector<8x128xf32>
    %8 = arith.cmpf ogt, %6, %7 : vector<8x128xf32>
    %cst_7 = arith.constant 0.00999999977 : f32
    %9 = vector.broadcast %cst_7 : f32 to vector<8x128xf32>
    %10 = arith.mulf %9, %6 : vector<8x128xf32>
    %11 = arith.select %8, %6, %10 : vector<8x128xi1>, vector<8x128xf32>
    %c0_8 = arith.constant 0 : index
    %c0_9 = arith.constant 0 : index
    %12 = vector.load %arg4[%c0_8, %c0_9] : memref<128x128xf32, #tpu.memory_space<vmem>>, vector<128x128xf32>
    %cst_10 = arith.constant dense<0.000000e+00> : vector<8x128xf32>
    %13 = tpu.matmul %11, %12, %cst_10 {dimension_numbers = #tpu.dot_dimension_numbers<[1], [0], [0], [1], [0, 0, 1, 1], [], []>} : vector<8x128xf32>, vector<128x128xf32>, vector<8x128xf32> -> vector<8x128xf32>
    %c0_11 = arith.constant 0 : index
    %c0_12 = arith.constant 0 : index
    %14 = vector.load %arg5[%c0_11, %c0_12] : memref<1x128xf32, #tpu.memory_space<vmem>>, vector<1x128xf32>
    %15 = vector.broadcast %14 : vector<1x128xf32> to vector<8x128xf32>
    %16 = arith.addf %13, %15 : vector<8x128xf32>
    %cst_13 = arith.constant dense<0xFF800000> : vector<128xf32>
    %17 = vector.multi_reduction <maximumf>, %16, %cst_13 [0] : vector<8x128xf32> to vector<128xf32>
    %18 = vector.shape_cast %17 : vector<128xf32> to vector<1x128xf32>
    %19 = vector.broadcast %18 : vector<1x128xf32> to vector<8x128xf32>
    %20 = arith.subf %16, %19 : vector<8x128xf32>
    %21 = math.exp %20 : vector<8x128xf32>
    %cst_14 = arith.constant dense<0.000000e+00> : vector<128xf32>
    %22 = vector.multi_reduction <add>, %21, %cst_14 [0] : vector<8x128xf32> to vector<128xf32>
    %23 = vector.shape_cast %22 : vector<128xf32> to vector<1x128xf32>
    %24 = tpu.reciprocal %23 : vector<1x128xf32> -> vector<1x128xf32>
    %25 = vector.broadcast %24 : vector<1x128xf32> to vector<8x128xf32>
    %26 = arith.mulf %21, %25 : vector<8x128xf32>
    %c0_15 = arith.constant 0 : index
    %c0_16 = arith.constant 0 : index
    %c0_17 = arith.constant 0 : index
    %27 = vector.load %arg6[%c0_15, %c0_16, %c0_17] : memref<1x8x128xf32, #tpu.memory_space<vmem>>, vector<1x8x128xf32>
    %28 = vector.shape_cast %27 : vector<1x8x128xf32> to vector<8x128xf32>
    %29 = vector.shape_cast %26 : vector<8x128xf32> to vector<1x8x128xf32>
    tpu.vector_store %arg6[%c0_15, %c0_16, %c0_17], %29 {strides = array<i32>} : memref<1x8x128xf32, #tpu.memory_space<vmem>>, vector<1x8x128xf32>,
    return
  }
  func.func @transform_0(%arg0: i32) -> (i32, i32, i32) {
    %c0_i32 = arith.constant 0 : i32
    %c0_i32_0 = arith.constant 0 : i32
    %c0_i32_1 = arith.constant 0 : i32
    return %arg0, %c0_i32, %c0_i32_0 : i32, i32, i32
  }
  func.func @transform_1(%arg0: i32) -> (i32, i32) {
    %c0_i32 = arith.constant 0 : i32
    %c0_i32_0 = arith.constant 0 : i32
    %c0_i32_1 = arith.constant 0 : i32
    return %c0_i32, %c0_i32_0 : i32, i32
  }
  func.func @transform_2(%arg0: i32) -> (i32, i32) {
    %c0_i32 = arith.constant 0 : i32
    %c0_i32_0 = arith.constant 0 : i32
    %c0_i32_1 = arith.constant 0 : i32
    return %c0_i32, %c0_i32_0 : i32, i32
  }
  func.func @transform_3(%arg0: i32) -> (i32, i32) {
    %c0_i32 = arith.constant 0 : i32
    %c0_i32_0 = arith.constant 0 : i32
    %c0_i32_1 = arith.constant 0 : i32
    return %c0_i32, %c0_i32_0 : i32, i32
  }
  func.func @transform_4(%arg0: i32) -> (i32, i32) {
    %c0_i32 = arith.constant 0 : i32
    %c0_i32_0 = arith.constant 0 : i32
    %c0_i32_1 = arith.constant 0 : i32
    return %c0_i32, %c0_i32_0 : i32, i32
  }
  func.func @transform_5(%arg0: i32) -> (i32, i32, i32) {
    %c0_i32 = arith.constant 0 : i32
    %c0_i32_0 = arith.constant 0 : i32
    %c0_i32_1 = arith.constant 0 : i32
    return %arg0, %c0_i32, %c0_i32_0 : i32, i32, i32
  }
}

</mosaic_0001>

<bundles_post_ra>
// kernel: tpu_custom_call.1
= control target key start
LH: loop header
LB: loop body
LE: loop exit
PB: predicated region body
PF: predicated region fallthrough
CT: control target
= control target key end

     0   :  { %10 = vsyncpa [#allocation3], 0  ;;  %s938_s0 = inlined_call_operand.hbm [shape: f32[4,8,128], index: 0, kind: input, shape index: {}]   ;;  %s939_s1 = inlined_call_operand.hbm [shape: f32[128,128], index: 1, kind: input, shape index: {}]   ;;  %s940_s2 = inlined_call_operand.vmem [shape: f32[1,128], index: 2, kind: input, shape index: {}]   ;;  %s941_s3 = inlined_call_operand.hbm [shape: f32[128,128], index: 3, kind: input, shape index: {}]   ;;  %s942_s4 = inlined_call_operand.vmem [shape: f32[1,128], index: 4, kind: input, shape index: {}]   ;;  %s943_s5 = inlined_call_operand.hbm [shape: f32[4,8,128], index: 5, kind: output, shape index: {}]  }
   0x1   :  { %12 = vsyncpa [#allocation3 + $0x1], 0 }
   0x2   :  { %13 = vsyncpa [#allocation6], 0 }
   0x3   :  { %14 = vsyncpa [#allocation4], 0 }
   0x4   :  { %16 = vsyncpa [#allocation4 + $0x1], 0  ;;  %s782_s18 = smov 0   ;;  %s784_s19 = smov 0  }
   0x5   :  { %s786_s20 = smov 0   ;;  %s788_s21 = smov 0  }
   0x6 LB: > { %s174_s24 = sshll.u32 %s939_s1, 4  ;;  %s806_s25 = sadd.s32 4294967295, %s746_s21   ;;  %s746_s21 = sphi %s788_s21, %s953_s21   ;;  %s742_s20 = sphi %s786_s20, %s952_s20   ;;  %s738_s19 = sphi %s784_s19, %s951_s19   ;;  %s734_s18 = sphi %s782_s18, %s950_s18   ;;  %s175_s24 = int_to_ptr.hbm [resolvable:$true] %s174_s24 }
   0x7   : > { %p496_p0 = scmp.ge.s32.totalorder %s746_s21, 1  ;;  %p43_p1 = scmp.eq.s32.totalorder %s806_s25, 0 }
   0x8   : > { %p163_p2 = scmp.lt.s32.totalorder %s746_s21, 5  ;;  %s748_s27 = smov [#allocation5]  }
   0x9   : > { %s176_s28 = sshll.u32 %s748_s27, 4  ;;  %s191_s6 = sshll.u32 %s941_s3, 4  ;;  %s177_s28 = int_to_ptr.vmem [resolvable:$true] %s176_s28  ;;  %s192_s6 = int_to_ptr.hbm [resolvable:$true] %s191_s6 }
   0xa   : > { %p811_p3 = pnand %p496_p0, %p163_p2  ;;  %s749_s7 = smov [#allocation7]  }
   0xb   : > { %s193_s8 = sshll.u32 %s749_s7, 4  ;;  %s750_s9 = smov 128   ;;  %s194_s8 = int_to_ptr.vmem [resolvable:$true] %s193_s8 }
   0xc   : > { %p523_p4 = pneg %p811_p3  ;;  %s751_s10 = smov 8  }
   0xd   : > { %s495_s11 = sadd.s32 4294967294, %s746_s21   ;;  %s824_s12 = sadd.s32 1, %s746_s21  }
   0xe   : > { %p524_p5 = pnand %p523_p4, %p43_p1  ;;  %s26_s13 = ssub.s32 %s746_s21, %s824_s12 }
   0xf   : > { %s29_s14 = sadd.s32 1, %s742_s20  ;;  %p27_p6 = scmp.eq.s32.totalorder %s26_s13, 0 }
  0x10   : > { %526 = dma.hbm_to_vmem [thread:$0]  (!%p524_p5), %s175_s24, 2048, %s177_s28, [#allocation6], %s750_s9, %s750_s9, %s751_s10  }
  0x11   : > { %529 = dma.hbm_to_vmem [thread:$0]  (!%p524_p5), %s192_s6, 2048, %s194_s8, [#allocation6], %s750_s9, %s750_s9, %s751_s10  }
  0x12   : > { %p36_p7 = scmp.ne.s32.totalorder %s742_s20, %s738_s19  ;;  %p37_p8 = scmp.eq.s32.totalorder %s746_s21, 0 }
  0x13   : > { %p42_p9 = scmp.ne.s32.totalorder %s738_s19, %s734_s18  ;;  %p150_p12 = scmp.eq.s32.totalorder %s806_s25, 3 }
  0x14   : > { %s835_s15 = scalar_select %p27_p6, %s742_s20, %s29_s14  }
  0x15   : > { %p837_p10 = por %p37_p8, %p36_p7  ;;  %p843_p11 = por %p43_p1, %p42_p9 }
  0x16   : > { %p156_p13 = scmp.eq.s32.totalorder %s495_s11, 3  ;;  %p540_p0 = scmp.lt.s32.totalorder %s746_s21, 4 }
  0x17   : > { %s210_s22 = sand.u32 1, %s742_s20   ;;  %p850_p2 = por %p150_p12, %p36_p7 }
  0x18   : > { %p854_p4 = por %p156_p13, %p42_p9  ;;  %s500_s27 = sshll.u32 %s210_s22, 3 }
  0x19   : > { %s501_s28 = sshll.u32 %s746_s21, 3  ;;  %s214_s7 = scalar_lea.vmem [#allocation2], %s500_s27 }
  0x1a   : > { %s218_s6 = scalar_lea.hbm %s938_s0, %s501_s28  ;;  %s222_s8 = sshll.u32 %s214_s7, 4  ;;  %s223_s8 = int_to_ptr.vmem [resolvable:$true] %s222_s8 }
  0x1b   : > { %s220_s9 = sshll.u32 %s218_s6, 4  ;;  %p864_p5 = pnand %p540_p0, %p837_p10  ;;  %s221_s9 = int_to_ptr.hbm [resolvable:$true] %s220_s9 }
  0x1c   : > { %s211_s11 = scalar_lea.sflag [#allocation3], %s210_s22  ;;  %s646_s13 = sshra.s32 %s221_s9, 4  ;;  %s647_s13 = int_to_ptr.hbm [resolvable:$true] %s646_s13 }
  0x1d   : > { %s648_s14 = scalar_lea.hbm %s647_s13, 8  ;;  %p650_p7 = pneg %p864_p5 }
  0x1e   : > { %p649_p6 = scmp.ne.s32.totalorder %s647_s13, %s648_s14  ;;  %s653_s29 = scalar_lea.hbm %s938_s0, 32 }
  0x1f   : > { %p654_p10 = scmp.lt.s32.totalorder %s647_s13, %s938_s0  ;;  %p655_p12 = scmp.lt.s32.totalorder %s653_s29, %s648_s14 }
  0x20   : > { %p651_p8 = pnand %p650_p7, %p649_p6 }
  0x21   : > { %p656_p13 = por %p655_p12, %p654_p10 }
  0x22   : > { %p652_p9 = pneg %p651_p8 }
  0x24   : > { %p657_p0 = pnand %p656_p13, %p652_p9 }
  0x26   : > { %660 = shalt.err (!%p657_p0)
}
  0x27   : > { %533 = dma.hbm_to_vmem [thread:$0]  (!%p864_p5), %s221_s9, 128, %s223_s8, %s211_s11  }
  0x28   : > { %231 = sbr.rel (%p811_p3) target bundleno = 396 (0x18c), region = 40  ;;  %s881_s22 = sand.u32 (!%p811_p3), 1, %s738_s19  }
  0x29   : > { %s503_s6 = sshll.u32 (!%p811_p3), %s881_s22, 3  ;;  %s234_s7 = scalar_lea.sflag (!%p811_p3), [#allocation3], %s881_s22 }
  0x2a   : > { %s887_s13 = scalar_lea.vmem (!%p811_p3), [#allocation2], %s503_s6 }
  0x2d   : > { %721 = dma.done.wait (%p843_p11), %s234_s7, 128  }
  0x2e   : > { %723 = vsyncadd (%p843_p11), %s234_s7, 4294967168 }
  0x2f   : > { %725 = dma.done.wait (%p43_p1), [#allocation6], 4096  }
  0x30   : > { %727 = vsyncadd (%p43_p1), [#allocation6], 4294963200  ;;  %v291_v0 = vld [vmem:[#allocation5 + $0x78] sm:$0xff]  ;;  %v290_v1 = vld [vmem:[#allocation5 + $0x70] sm:$0xff]  ;;  %s508_s10 = sshll.u32 %s806_s25, 3  ;;  %s274_s28 = scalar_lea.vmem [#allocation8], %s503_s6 }
  0x31   : > { %296 = vmatpush.msra.mxu0 %v291_v0  ;;  %v289_v2 = vld [vmem:[#allocation5 + $0x68] sm:$0xff]  ;;  %v288_v3 = vld [vmem:[#allocation5 + $0x60] sm:$0xff]  ;;  %v334_v4 = vld [vmem:[#allocation7 + $0x78] sm:$0xff]  ;;  %s401_s27 = scalar_lea.hbm %s943_s5, %s508_s10  ;;  %s403_s29 = sshll.u32 %s274_s28, 4  ;;  %s404_s29 = int_to_ptr.vmem [resolvable:$true] %s403_s29 }
  0x32   : > { %v287_v5 = vld [vmem:[#allocation5 + $0x58] sm:$0xff]  ;;  %339 = vmatpush.msra.mxu1 %v334_v4  ;;  %v333_v6 = vld [vmem:[#allocation7 + $0x70] sm:$0xff]  ;;  %v332_v7 = vld [vmem:[#allocation7 + $0x68] sm:$0xff]  ;;  %s405_s30 = sshll.u32 %s401_s27, 4  ;;  %s391_s25 = scalar_lea.sflag [#allocation4], %s881_s22  ;;  %s406_s30 = int_to_ptr.hbm [resolvable:$true] %s405_s30 }
  0x33   : > { %297 = vmatpush.msra.mxu0 %v290_v1  ;;  %v286_v8 = vld [vmem:[#allocation5 + $0x50] sm:$0xff]  ;;  %v331_v9 = vld [vmem:[#allocation7 + $0x60] sm:$0xff]  ;;  %v285_v10 = vld [vmem:[#allocation5 + $0x48] sm:$0xff]  ;;  %s690_s16 = sshra.s32 %s406_s30, 4  ;;  %s696_s6 = scalar_lea.hbm %s943_s5, 32  ;;  %s691_s16 = int_to_ptr.hbm [resolvable:$true] %s690_s16 }
  0x34   : > { %340 = vmatpush.msra.mxu1 %v333_v6  ;;  %v330_v11 = vld [vmem:[#allocation7 + $0x58] sm:$0xff]  ;;  %v284_v12 = vld [vmem:[#allocation5 + $0x40] sm:$0xff]  ;;  %v329_v13 = vld [vmem:[#allocation7 + $0x50] sm:$0xff]  ;;  %s692_s7 = scalar_lea.hbm %s691_s16, 8  ;;  %p697_p5 = scmp.lt.s32.totalorder %s691_s16, %s943_s5 }
  0x35   : > { %298 = vmatpush.msra.mxu0 %v289_v2  ;;  %v283_v14 = vld [vmem:[#allocation5 + $0x38] sm:$0xff]  ;;  %v328_v15 = vld [vmem:[#allocation7 + $0x48] sm:$0xff]  ;;  %v282_v16 = vld [vmem:[#allocation5 + $0x30] sm:$0xff]  ;;  %p693_p1 = scmp.ne.s32.totalorder %s691_s16, %s692_s7  ;;  %p698_p6 = scmp.lt.s32.totalorder %s696_s6, %s692_s7 }
  0x36   : > { %341 = vmatpush.msra.mxu1 %v332_v7  ;;  %v327_v17 = vld [vmem:[#allocation7 + $0x40] sm:$0xff]  ;;  %v281_v18 = vld [vmem:[#allocation5 + $0x28] sm:$0xff]  ;;  %v326_v19 = vld [vmem:[#allocation7 + $0x38] sm:$0xff] }
  0x37   : > { %299 = vmatpush.msra.mxu0 %v288_v3  ;;  %v280_v20 = vld [vmem:[#allocation5 + $0x20] sm:$0xff]  ;;  %v325_v21 = vld [vmem:[#allocation7 + $0x30] sm:$0xff]  ;;  %v279_v22 = vld [vmem:[#allocation5 + $0x18] sm:$0xff]  ;;  %p694_p3 = pnand %p693_p1, %p850_p2  ;;  %p699_p7 = por %p698_p6, %p697_p5 }
  0x38   : > { %342 = vmatpush.msra.mxu1 %v331_v9  ;;  %v324_v23 = vld [vmem:[#allocation7 + $0x28] sm:$0xff]  ;;  %v278_v24 = vld [vmem:[#allocation5 + $0x10] sm:$0xff]  ;;  %v323_v25 = vld [vmem:[#allocation7 + $0x20] sm:$0xff] }
  0x39   : > { %300 = vmatpush.msra.mxu0 %v287_v5  ;;  %v277_v26 = vld [vmem:[#allocation5 + $0x8] sm:$0xff]  ;;  %v322_v27 = vld [vmem:[#allocation7 + $0x18] sm:$0xff]  ;;  %v276_v28 = vld [vmem:[#allocation5] sm:$0xff]  ;;  %p695_p11 = pneg %p694_p3 }
  0x3a   : > { %343 = vmatpush.msra.mxu1 %v330_v11  ;;  %v275_v29 = vld [vmem:[%s887_s13] sm:$0xff]  ;;  %v320_v31 = vld [vmem:[#allocation7 + $0x8] sm:$0xff]  ;;  %v319_v32 = vld [vmem:[#allocation7] sm:$0xff] }
  0x3b   : > { %301 = vmatpush.msra.mxu0 %v286_v8  ;;  %v321_v30 = vld [vmem:[#allocation7 + $0x10] sm:$0xff]  ;;  %p700_p8 = pnand %p699_p7, %p695_p11 }
  0x3c   : > { %344 = vmatpush.msra.mxu1 %v329_v13  ;;  %v580_v33 = vld [vmem:[%s940_s2] ss:$0 sm:$0xff] }
  0x3d   : > { %302 = vmatpush.msra.mxu0 %v285_v10  ;;  %v581_v38 = vld [vmem:[%s942_s4] ss:$0 sm:$0xff] }
  0x3e   : > { %345 = vmatpush.msra.mxu1 %v328_v15 }
  0x3f   : > { %303 = vmatpush.msra.mxu0 %v284_v12 }
  0x40   : > { %346 = vmatpush.msra.mxu1 %v327_v17 }
  0x41   : > { %304 = vmatpush.msra.mxu0 %v283_v14 }
  0x42   : > { %347 = vmatpush.msra.mxu1 %v326_v19 }
  0x43   : > { %305 = vmatpush.msra.mxu0 %v282_v16 }
  0x44   : > { %348 = vmatpush.msra.mxu1 %v325_v21 }
  0x45   : > { %306 = vmatpush.msra.mxu0 %v281_v18 }
  0x46   : > { %349 = vmatpush.msra.mxu1 %v324_v23 }
  0x47   : > { %307 = vmatpush.msra.mxu0 %v280_v20 }
  0x48   : > { %350 = vmatpush.msra.mxu1 %v323_v25 }
  0x49   : > { %308 = vmatpush.msra.mxu0 %v279_v22 }
  0x4a   : > { %351 = vmatpush.msra.mxu1 %v322_v27 }
  0x4b   : > { %309 = vmatpush.msra.mxu0 %v278_v24 }
  0x4c   : > { %352 = vmatpush.msra.mxu1 %v321_v30 }
  0x4d   : > { %310 = vmatpush.msra.mxu0 %v277_v26 }
  0x4e   : > { %353 = vmatpush.msra.mxu1 %v320_v31 }
  0x4f   : > { %311 = vmatpush.msra.mxu0 %v276_v28 }
  0x50   : > { %312 = vmatmul.f32.vlgmr.msra.gmra.mxu0 %v275_v29  ;;  %354 = vmatpush.msra.mxu1 %v319_v32 }
  0xcd   : > { %v313_v34 = vpop.f32.mrf.mxu0 }
  0xce   : > { %v314_v35 = vadd.f32 %v580_v33, %v313_v34 }
  0xd0   : > { %vm316_vm0 = vcmp.gt.f32.partialorder %v314_v35, 0.0  ;;  %v317_v36 = vmul.f32 0.01, %v314_v35 }
  0xd2   : > { %v318_v37 = vsel %vm316_vm0, %v314_v35, %v317_v36 }
  0xd3   : > { %355 = vmatmul.f32.vlgmr.msra.gmra.mxu1 %v318_v37 }
 0x150   : > { %v356_v39 = vpop.f32.mrf.mxu1 }
 0x151   : > { %v357_v40 = vadd.f32 %v581_v38, %v356_v39 }
 0x153   : > { %v359_v41 = vrot.slane %v357_v40, 4 }
 0x155   : > { %v360_v42 = vmax.f32 %v357_v40, %v359_v41 }
 0x157   : > { %v361_v43 = vrot.slane %v360_v42, 2 }
 0x159   : > { %v362_v44 = vmax.f32 %v360_v42, %v361_v43 }
 0x15b   : > { %v363_v45 = vrot.slane %v362_v44, 1 }
 0x15d   : > { %v364_v46 = vmax.f32 %v362_v44, %v363_v45 }
 0x15f   : > { %v365_v47 = vsub.f32 %v357_v40, %v364_v46 }
 0x161   : > { %v366_v48 = vmul.f32 1.442695, %v365_v47 }
 0x163   : > { %582 = vpow2.f32 %v366_v48 }
 0x169   : > { %v583_v49 = vpop.eup %582 }
 0x16a   : > { %v368_v50 = vrot.slane %v583_v49, 4 }
 0x16c   : > { %v369_v51 = vadd.f32 %v583_v49, %v368_v50 }
 0x16e   : > { %v370_v52 = vrot.slane %v369_v51, 2 }
 0x170   : > { %v371_v53 = vadd.f32 %v370_v52, %v369_v51 }
 0x172   : > { %v372_v54 = vrot.slane %v371_v53, 1 }
 0x174   : > { %v373_v55 = vadd.f32 %v372_v54, %v371_v53 }
 0x176   : > { %584 = vrcp.f32 %v373_v55  ;;  %v385_v59 = vand.u32 2147483648, %v373_v55  ;;  %v383_v61 = vand.u32 2147483647, %v373_v55  ;;  %vm379_vm2 = vweird.f32 %v373_v55 }
 0x178   : > { %v386_v63 = vor.u32 1.1754944e-38, %v385_v59  ;;  %vm384_vm4 = vcmp.eq.f32.partialorder %v383_v61, 8.507059e+37 }
 0x17c   : > { %v585_v56 = vpop.eup %584 }
 0x17d   : > { %v375_v57 = vmul.f32 %v585_v56, %v373_v55  ;;  %vm380_vm1 = vweird.f32 %v585_v56 }
 0x17e   : > { %vm381_vm3 = vmor %vm379_vm2, %vm380_vm1 }
 0x17f   : > { %v376_v58 = vsub.f32 1.0, %v375_v57 }
 0x181   : > { %v377_v60 = vmul.f32 %v585_v56, %v376_v58 }
 0x183   : > { %v378_v62 = vadd.f32 %v585_v56, %v377_v60 }
 0x185   : > { %v382_v0 = vsel %vm381_vm3, %v585_v56, %v378_v62 }
 0x186   : > { %v387_v1 = vsel %vm384_vm4, %v386_v63, %v382_v0 }
 0x187   : > { %v388_v2 = vmul.f32 %v583_v49, %v387_v1 }
 0x189   : > { %389 = vst [vmem:[%s274_s28] sm:$0xff] %v388_v2 }
 0x18a   : > { %703 = shalt.err (!%p700_p8)
}
 0x18b   : > { %521 = dma.vmem_to_hbm [thread:$0]  (%p850_p2), %s404_s29, 128, %s406_s30, %s391_s25  }
 0x18c PF: > { %p543_p9 = scmp.ge.s32.totalorder %s746_s21, 2  ;;  %s417_s22 = sand.u32 1, %s734_s18  }
 0x18d   : > { %s418_s9 = scalar_lea.sflag [#allocation4], %s417_s22 }
 0x18e   : > { %p535_p10 = pnand %p543_p9, %p854_p4 }
 0x190   : > { %p536_p12 = pneg %p535_p10 }
 0x192   : > { %729 = dma.done.wait (%p536_p12), %s418_s9, 128  }
 0x193   : > { %731 = vsyncadd (%p536_p12), %s418_s9, 4294967168  ;;  %p19_p13 = scmp.ge.s32.totalorder %s824_s12, 6   ;;  %s950_s18 = smov %s738_s19 }
 0x194   : > { %s951_s19 = smov %s742_s20  ;;  %s952_s20 = smov %s835_s15 }
 0x195   : > { %s953_s21 = smov %s824_s12  ;;  %21 = sbr.rel (!%p19_p13) target bundleno = 6 (0x6), region = 93 }
 0x19a   :  { %424 = vsyncpa [#allocation3], 1 }
 0x19b   :  { %426 = vsyncpa [#allocation3 + $0x1], 1 }
 0x19c   :  { %427 = vsyncpa [#allocation6], 1 }
 0x19d   :  { %428 = vsyncpa [#allocation4], 1 }
 0x19e   :  { %430 = vsyncpa [#allocation4 + $0x1], 1 }

</bundles_post_ra>
